<compile_context>
chip_gen: v5e
topology: v5e:2x2
jax: 0.10.0
libtpu: 0.0.40
codegen_flags: <defaults>
</compile_context>

<pallas_src>
import jax
import jax.numpy as jnp
from jax.experimental import pallas as pl
from jax.experimental.pallas import tpu as pltpu

SEQ = 8      # sequence length
BATCH = 2    # batch size
HID = 60     # hidden size (fixed by the module)
INP = 1      # input size (fixed by the module)


def _rnn_kernel(x_ref, h0_ref,
                wih0_ref, whh0_ref, whh1_ref,
                b0_ref, wih1_ref, b1_ref,
                wlo_ref, blo_ref,
                y_ref, hout_ref):
    """Whole 2-layer RNN, fully unrolled over time, single invocation.

    x_ref    : (S*B, 1)   f32   flattened time-major input
    h0_ref   : (2, B, H)  f32   initial hidden state
    wih0_ref : (1, H)     f32   W_ih0 row (input_size == 1)
    whh0_ref : (H, H)     f32   W_hh0^T
    whh1_ref : (H, H)     f32   W_hh1^T
    b0_ref   : (1, H)     f32   b_ih0 + b_hh0
    wih1_ref : (H, H)     f32   W_ih1^T
    b1_ref   : (1, H)     f32   b_ih1 + b_hh1
    wlo_ref  : (1, H)     f32   output Linear weight row
    blo_ref  : (1, 1)     f32   output Linear bias
    y_ref    : (S*B, 1)   f32
    hout_ref : (2, B, H)  f32   final hidden state
    """
    SB = x_ref.shape[0]
    B = h0_ref.shape[1]
    H = whh0_ref.shape[0]
    S = SB // B

    # Hoisted layer-0 input projection + fused bias (INP == 1 -> broadcast mul).
    pre0 = x_ref[...] * wih0_ref[...] + b0_ref[...]          # (S*B, H)

    # Loop-invariant operands loaded once.
    whh0 = whh0_ref[...]
    whh1 = whh1_ref[...]
    wih1 = wih1_ref[...]
    b1b = b1_ref[...]                                        # (1, H), broadcasts

    h0 = h0_ref[0]                                           # (B, H)
    h1 = h0_ref[1]                                           # (B, H)

    def _step0(h0_prev, t):
        # layer-0 recurrence for step t
        return jnp.tanh(pre0[t * B:(t + 1) * B]
                        + jnp.dot(h0_prev, whh0,
                                  preferred_element_type=jnp.float32))

    def _step1(h0_same_step, h1_prev):
        # layer-1 recurrence (input comes from layer-0 at the SAME step)
        return jnp.tanh(jnp.dot(h0_same_step, wih1,
                                preferred_element_type=jnp.float32)
                        + b1b
                        + jnp.dot(h1_prev, whh1,
                                  preferred_element_type=jnp.float32))

    # Wavefront schedule (fully static unroll):
    #   prologue : layer-0 step 0
    #   stage t  : layer-0 step t  AND  layer-1 step t-1   (independent dots)
    #   epilogue : layer-1 step S-1
    h1s = []
    h0 = _step0(h0, 0)                                       # layer-0, step 0
    for t in range(1, S):
        h0_next = _step0(h0, t)                              # layer-0, step t
        h1 = _step1(h0, h1)                                  # layer-1, step t-1
        h1s.append(h1)
        h0 = h0_next
    h1 = _step1(h0, h1)                                      # layer-1, step S-1
    h1s.append(h1)

    hout_ref[0] = h0
    hout_ref[1] = h1

    # Output projection on register-resident history: broadcast-mul + lane reduce,
    # single store at the epilogue (N == 1, so no degenerate matmul).
    h1_all = jnp.concatenate(h1s, axis=0)                    # (S*B, H), in vregs
    y_ref[...] = (jnp.sum(h1_all * wlo_ref[...], axis=-1, keepdims=True)
                  + blo_ref[...])                            # (S*B, 1)


def prepare_weights(w_ih0, w_hh0, b_ih0, b_hh0,
                    w_ih1, w_hh1, b_ih1, b_hh1,
                    w_lo, b_lo):
    """One-time host-side weight prep (transposes, bias fusion, reshapes)."""
    wih0_row = w_ih0.astype(jnp.float32).reshape(1, HID)      # (1, H)
    whh0_t = w_hh0.T.astype(jnp.float32)                      # (H, H)
    whh1_t = w_hh1.T.astype(jnp.float32)                      # (H, H)
    b0 = (b_ih0 + b_hh0).astype(jnp.float32).reshape(1, HID)  # (1, H)
    wih1_t = w_ih1.T.astype(jnp.float32)                      # (H, H)
    b1 = (b_ih1 + b_hh1).astype(jnp.float32).reshape(1, HID)  # (1, H)
    wlo_row = w_lo.astype(jnp.float32).reshape(1, HID)        # (1, H)
    blo = b_lo.astype(jnp.float32).reshape(1, 1)              # (1, 1)
    return (wih0_row, whh0_t, whh1_t, b0, wih1_t, b1, wlo_row, blo)


@jax.jit
def rnnstep_pallas(x, hidden, prepped):
    """x: (S, B, 1); hidden: (2, B, H); prepped from prepare_weights().

    Returns (y: (S, B, 1), h_out: (2, B, H)).
    """
    S, B, _ = x.shape
    H = hidden.shape[-1]
    x2d = x.reshape(S * B, 1).astype(jnp.float32)
    hidden = hidden.astype(jnp.float32)

    vmem = pl.BlockSpec(memory_space=pltpu.MemorySpace.VMEM)
    n_inputs = 2 + len(prepped)

    y_flat, h_out = pl.pallas_call(
        _rnn_kernel,
        out_shape=(jax.ShapeDtypeStruct((S * B, 1), jnp.float32),
                   jax.ShapeDtypeStruct((2, B, H), jnp.float32)),
        in_specs=[vmem] * n_inputs,
        out_specs=(vmem, vmem),
    )(x2d, hidden, *prepped)

    return y_flat.reshape(S, B, 1), h_out


def rnnstep_ref(x, hidden,
                w_ih0, w_hh0, b_ih0, b_hh0,
                w_ih1, w_hh1, b_ih1, b_hh1,
                w_lo, b_lo):
    """Pure-JAX reference matching torch.nn.RNN(num_layers=2) + per-step Linear."""
    S = x.shape[0]
    h0, h1 = hidden[0], hidden[1]
    ys = []
    for t in range(S):
        xt = x[t]                                              # (B, 1)
        h0 = jnp.tanh(xt @ w_ih0.T + b_ih0 + h0 @ w_hh0.T + b_hh0)
        h1 = jnp.tanh(h0 @ w_ih1.T + b_ih1 + h1 @ w_hh1.T + b_hh1)
        ys.append(h1 @ w_lo.T + b_lo)
    return jnp.stack(ys, axis=0), jnp.stack([h0, h1], axis=0)


if __name__ == "__main__":
    key = jax.random.PRNGKey(0)
    ks = jax.random.split(key, 12)
    bound = 1.0 / jnp.sqrt(HID)

    # Deterministic synthetic parameters (uniform like PyTorch default init).
    w_ih0 = jax.random.uniform(ks[0], (HID, INP), jnp.float32, -bound, bound)
    w_hh0 = jax.random.uniform(ks[1], (HID, HID), jnp.float32, -bound, bound)
    b_ih0 = jax.random.uniform(ks[2], (HID,), jnp.float32, -bound, bound)
    b_hh0 = jax.random.uniform(ks[3], (HID,), jnp.float32, -bound, bound)
    w_ih1 = jax.random.uniform(ks[4], (HID, HID), jnp.float32, -bound, bound)
    w_hh1 = jax.random.uniform(ks[5], (HID, HID), jnp.float32, -bound, bound)
    b_ih1 = jax.random.uniform(ks[6], (HID,), jnp.float32, -bound, bound)
    b_hh1 = jax.random.uniform(ks[7], (HID,), jnp.float32, -bound, bound)
    w_lo = jax.random.uniform(ks[8], (1, HID), jnp.float32, -bound, bound)
    b_lo = jax.random.uniform(ks[9], (1,), jnp.float32, -bound, bound)

    # Inputs (time-major, like torch.nn.RNN default).
    x = jax.random.normal(ks[10], (SEQ, BATCH, INP), jnp.float32)
    hidden = jax.random.normal(ks[11], (2, BATCH, HID), jnp.float32)

    params = (w_ih0, w_hh0, b_ih0, b_hh0,
              w_ih1, w_hh1, b_ih1, b_hh1,
              w_lo, b_lo)

    # Weight prep done once (model-init time), kernel launch is jitted.
    prepped = prepare_weights(*params)

    y, h_out = rnnstep_pallas(x, hidden, prepped)
    jax.block_until_ready((y, h_out))

    y_ref, h_ref = rnnstep_ref(x, hidden, *params)
    assert y.shape == (SEQ, BATCH, 1)
    assert h_out.shape == (2, BATCH, HID)
    assert jnp.allclose(y, y_ref, atol=1e-4), "output mismatch"
    assert jnp.allclose(h_out, h_ref, atol=1e-4), "hidden-state mismatch"

    print("KERNEL_OK")
</pallas_src>

<mosaic_0001>
module attributes {stable_mosaic.version = 11 : i64} {
  func.func @_rnn_kernel(%arg0: memref<16x1xf32, #tpu.memory_space<vmem>>, %arg1: memref<2x2x60xf32, #tpu.memory_space<vmem>>, %arg2: memref<1x60xf32, #tpu.memory_space<vmem>>, %arg3: memref<60x60xf32, #tpu.memory_space<vmem>>, %arg4: memref<60x60xf32, #tpu.memory_space<vmem>>, %arg5: memref<1x60xf32, #tpu.memory_space<vmem>>, %arg6: memref<60x60xf32, #tpu.memory_space<vmem>>, %arg7: memref<1x60xf32, #tpu.memory_space<vmem>>, %arg8: memref<1x60xf32, #tpu.memory_space<vmem>>, %arg9: memref<1x1xf32, #tpu.memory_space<vmem>>, %arg10: memref<16x1xf32, #tpu.memory_space<vmem>>, %arg11: memref<2x2x60xf32, #tpu.memory_space<vmem>>) attributes {dimension_semantics = [], scalar_prefetch = 0 : i64, scratch_operands = 0 : i64, tpu.core_type = #tpu.core_type<tc>} {
    %c0 = arith.constant 0 : index
    %c0_0 = arith.constant 0 : index
    %0 = vector.load %arg0[%c0, %c0_0] : memref<16x1xf32, #tpu.memory_space<vmem>>, vector<16x1xf32>
    %c0_1 = arith.constant 0 : index
    %c0_2 = arith.constant 0 : index
    %1 = vector.load %arg2[%c0_1, %c0_2] : memref<1x60xf32, #tpu.memory_space<vmem>>, vector<1x60xf32>
    %2 = vector.broadcast %0 : vector<16x1xf32> to vector<16x60xf32>
    %3 = vector.broadcast %1 : vector<1x60xf32> to vector<16x60xf32>
    %4 = arith.mulf %2, %3 : vector<16x60xf32>
    %c0_3 = arith.constant 0 : index
    %c0_4 = arith.constant 0 : index
    %5 = vector.load %arg5[%c0_3, %c0_4] : memref<1x60xf32, #tpu.memory_space<vmem>>, vector<1x60xf32>
    %6 = vector.broadcast %5 : vector<1x60xf32> to vector<16x60xf32>
    %7 = arith.addf %4, %6 : vector<16x60xf32>
    %c0_5 = arith.constant 0 : index
    %c0_6 = arith.constant 0 : index
    %8 = vector.load %arg3[%c0_5, %c0_6] : memref<60x60xf32, #tpu.memory_space<vmem>>, vector<60x60xf32>
    %c0_7 = arith.constant 0 : index
    %c0_8 = arith.constant 0 : index
    %9 = vector.load %arg4[%c0_7, %c0_8] : memref<60x60xf32, #tpu.memory_space<vmem>>, vector<60x60xf32>
    %c0_9 = arith.constant 0 : index
    %c0_10 = arith.constant 0 : index
    %10 = vector.load %arg6[%c0_9, %c0_10] : memref<60x60xf32, #tpu.memory_space<vmem>>, vector<60x60xf32>
    %c0_11 = arith.constant 0 : index
    %c0_12 = arith.constant 0 : index
    %11 = vector.load %arg7[%c0_11, %c0_12] : memref<1x60xf32, #tpu.memory_space<vmem>>, vector<1x60xf32>
    %c0_13 = arith.constant 0 : index
    %c0_14 = arith.constant 0 : index
    %c0_15 = arith.constant 0 : index
    %12 = vector.load %arg1[%c0_13, %c0_14, %c0_15] : memref<2x2x60xf32, #tpu.memory_space<vmem>>, vector<1x2x60xf32>
    %13 = vector.shape_cast %12 : vector<1x2x60xf32> to vector<2x60xf32>
    %c1 = arith.constant 1 : index
    %c0_16 = arith.constant 0 : index
    %c0_17 = arith.constant 0 : index
    %14 = vector.load %arg1[%c1, %c0_16, %c0_17] : memref<2x2x60xf32, #tpu.memory_space<vmem>>, vector<1x2x60xf32>
    %15 = vector.shape_cast %14 : vector<1x2x60xf32> to vector<2x60xf32>
    %16 = vector.extract_strided_slice %7 {offsets = [0, 0], sizes = [2, 60], strides = [1, 1]} : vector<16x60xf32> to vector<2x60xf32>
    %cst = arith.constant dense<0.000000e+00> : vector<2x60xf32>
    %17 = tpu.matmul %13, %8, %cst {dimension_numbers = #tpu.dot_dimension_numbers<[1], [0], [0], [1], [0, 0, 1, 1], [], []>} : vector<2x60xf32>, vector<60x60xf32>, vector<2x60xf32> -> vector<2x60xf32>
    %18 = arith.addf %16, %17 : vector<2x60xf32>
    %19 = math.tanh %18 : vector<2x60xf32>
    %20 = vector.extract_strided_slice %7 {offsets = [2, 0], sizes = [2, 60], strides = [1, 1]} : vector<16x60xf32> to vector<2x60xf32>
    %cst_18 = arith.constant dense<0.000000e+00> : vector<2x60xf32>
    %21 = tpu.matmul %19, %8, %cst_18 {dimension_numbers = #tpu.dot_dimension_numbers<[1], [0], [0], [1], [0, 0, 1, 1], [], []>} : vector<2x60xf32>, vector<60x60xf32>, vector<2x60xf32> -> vector<2x60xf32>
    %22 = arith.addf %20, %21 : vector<2x60xf32>
    %23 = math.tanh %22 : vector<2x60xf32>
    %cst_19 = arith.constant dense<0.000000e+00> : vector<2x60xf32>
    %24 = tpu.matmul %19, %10, %cst_19 {dimension_numbers = #tpu.dot_dimension_numbers<[1], [0], [0], [1], [0, 0, 1, 1], [], []>} : vector<2x60xf32>, vector<60x60xf32>, vector<2x60xf32> -> vector<2x60xf32>
    %25 = vector.broadcast %11 : vector<1x60xf32> to vector<2x60xf32>
    %26 = arith.addf %24, %25 : vector<2x60xf32>
    %cst_20 = arith.constant dense<0.000000e+00> : vector<2x60xf32>
    %27 = tpu.matmul %15, %9, %cst_20 {dimension_numbers = #tpu.dot_dimension_numbers<[1], [0], [0], [1], [0, 0, 1, 1], [], []>} : vector<2x60xf32>, vector<60x60xf32>, vector<2x60xf32> -> vector<2x60xf32>
    %28 = arith.addf %26, %27 : vector<2x60xf32>
    %29 = math.tanh %28 : vector<2x60xf32>
    %30 = vector.extract_strided_slice %7 {offsets = [4, 0], sizes = [2, 60], strides = [1, 1]} : vector<16x60xf32> to vector<2x60xf32>
    %cst_21 = arith.constant dense<0.000000e+00> : vector<2x60xf32>
    %31 = tpu.matmul %23, %8, %cst_21 {dimension_numbers = #tpu.dot_dimension_numbers<[1], [0], [0], [1], [0, 0, 1, 1], [], []>} : vector<2x60xf32>, vector<60x60xf32>, vector<2x60xf32> -> vector<2x60xf32>
    %32 = arith.addf %30, %31 : vector<2x60xf32>
    %33 = math.tanh %32 : vector<2x60xf32>
    %cst_22 = arith.constant dense<0.000000e+00> : vector<2x60xf32>
    %34 = tpu.matmul %23, %10, %cst_22 {dimension_numbers = #tpu.dot_dimension_numbers<[1], [0], [0], [1], [0, 0, 1, 1], [], []>} : vector<2x60xf32>, vector<60x60xf32>, vector<2x60xf32> -> vector<2x60xf32>
    %35 = vector.broadcast %11 : vector<1x60xf32> to vector<2x60xf32>
    %36 = arith.addf %34, %35 : vector<2x60xf32>
    %cst_23 = arith.constant dense<0.000000e+00> : vector<2x60xf32>
    %37 = tpu.matmul %29, %9, %cst_23 {dimension_numbers = #tpu.dot_dimension_numbers<[1], [0], [0], [1], [0, 0, 1, 1], [], []>} : vector<2x60xf32>, vector<60x60xf32>, vector<2x60xf32> -> vector<2x60xf32>
    %38 = arith.addf %36, %37 : vector<2x60xf32>
    %39 = math.tanh %38 : vector<2x60xf32>
    %40 = vector.extract_strided_slice %7 {offsets = [6, 0], sizes = [2, 60], strides = [1, 1]} : vector<16x60xf32> to vector<2x60xf32>
    %cst_24 = arith.constant dense<0.000000e+00> : vector<2x60xf32>
    %41 = tpu.matmul %33, %8, %cst_24 {dimension_numbers = #tpu.dot_dimension_numbers<[1], [0], [0], [1], [0, 0, 1, 1], [], []>} : vector<2x60xf32>, vector<60x60xf32>, vector<2x60xf32> -> vector<2x60xf32>
    %42 = arith.addf %40, %41 : vector<2x60xf32>
    %43 = math.tanh %42 : vector<2x60xf32>
    %cst_25 = arith.constant dense<0.000000e+00> : vector<2x60xf32>
    %44 = tpu.matmul %33, %10, %cst_25 {dimension_numbers = #tpu.dot_dimension_numbers<[1], [0], [0], [1], [0, 0, 1, 1], [], []>} : vector<2x60xf32>, vector<60x60xf32>, vector<2x60xf32> -> vector<2x60xf32>
    %45 = vector.broadcast %11 : vector<1x60xf32> to vector<2x60xf32>
    %46 = arith.addf %44, %45 : vector<2x60xf32>
    %cst_26 = arith.constant dense<0.000000e+00> : vector<2x60xf32>
    %47 = tpu.matmul %39, %9, %cst_26 {dimension_numbers = #tpu.dot_dimension_numbers<[1], [0], [0], [1], [0, 0, 1, 1], [], []>} : vector<2x60xf32>, vector<60x60xf32>, vector<2x60xf32> -> vector<2x60xf32>
    %48 = arith.addf %46, %47 : vector<2x60xf32>
    %49 = math.tanh %48 : vector<2x60xf32>
    %50 = vector.extract_strided_slice %7 {offsets = [8, 0], sizes = [2, 60], strides = [1, 1]} : vector<16x60xf32> to vector<2x60xf32>
    %cst_27 = arith.constant dense<0.000000e+00> : vector<2x60xf32>
    %51 = tpu.matmul %43, %8, %cst_27 {dimension_numbers = #tpu.dot_dimension_numbers<[1], [0], [0], [1], [0, 0, 1, 1], [], []>} : vector<2x60xf32>, vector<60x60xf32>, vector<2x60xf32> -> vector<2x60xf32>
    %52 = arith.addf %50, %51 : vector<2x60xf32>
    %53 = math.tanh %52 : vector<2x60xf32>
    %cst_28 = arith.constant dense<0.000000e+00> : vector<2x60xf32>
    %54 = tpu.matmul %43, %10, %cst_28 {dimension_numbers = #tpu.dot_dimension_numbers<[1], [0], [0], [1], [0, 0, 1, 1], [], []>} : vector<2x60xf32>, vector<60x60xf32>, vector<2x60xf32> -> vector<2x60xf32>
    %55 = vector.broadcast %11 : vector<1x60xf32> to vector<2x60xf32>
    %56 = arith.addf %54, %55 : vector<2x60xf32>
    %cst_29 = arith.constant dense<0.000000e+00> : vector<2x60xf32>
    %57 = tpu.matmul %49, %9, %cst_29 {dimension_numbers = #tpu.dot_dimension_numbers<[1], [0], [0], [1], [0, 0, 1, 1], [], []>} : vector<2x60xf32>, vector<60x60xf32>, vector<2x60xf32> -> vector<2x60xf32>
    %58 = arith.addf %56, %57 : vector<2x60xf32>
    %59 = math.tanh %58 : vector<2x60xf32>
    %60 = vector.extract_strided_slice %7 {offsets = [10, 0], sizes = [2, 60], strides = [1, 1]} : vector<16x60xf32> to vector<2x60xf32>
    %cst_30 = arith.constant dense<0.000000e+00> : vector<2x60xf32>
    %61 = tpu.matmul %53, %8, %cst_30 {dimension_numbers = #tpu.dot_dimension_numbers<[1], [0], [0], [1], [0, 0, 1, 1], [], []>} : vector<2x60xf32>, vector<60x60xf32>, vector<2x60xf32> -> vector<2x60xf32>
    %62 = arith.addf %60, %61 : vector<2x60xf32>
    %63 = math.tanh %62 : vector<2x60xf32>
    %cst_31 = arith.constant dense<0.000000e+00> : vector<2x60xf32>
    %64 = tpu.matmul %53, %10, %cst_31 {dimension_numbers = #tpu.dot_dimension_numbers<[1], [0], [0], [1], [0, 0, 1, 1], [], []>} : vector<2x60xf32>, vector<60x60xf32>, vector<2x60xf32> -> vector<2x60xf32>
    %65 = vector.broadcast %11 : vector<1x60xf32> to vector<2x60xf32>
    %66 = arith.addf %64, %65 : vector<2x60xf32>
    %cst_32 = arith.constant dense<0.000000e+00> : vector<2x60xf32>
    %67 = tpu.matmul %59, %9, %cst_32 {dimension_numbers = #tpu.dot_dimension_numbers<[1], [0], [0], [1], [0, 0, 1, 1], [], []>} : vector<2x60xf32>, vector<60x60xf32>, vector<2x60xf32> -> vector<2x60xf32>
    %68 = arith.addf %66, %67 : vector<2x60xf32>
    %69 = math.tanh %68 : vector<2x60xf32>
    %70 = vector.extract_strided_slice %7 {offsets = [12, 0], sizes = [2, 60], strides = [1, 1]} : vector<16x60xf32> to vector<2x60xf32>
    %cst_33 = arith.constant dense<0.000000e+00> : vector<2x60xf32>
    %71 = tpu.matmul %63, %8, %cst_33 {dimension_numbers = #tpu.dot_dimension_numbers<[1], [0], [0], [1], [0, 0, 1, 1], [], []>} : vector<2x60xf32>, vector<60x60xf32>, vector<2x60xf32> -> vector<2x60xf32>
    %72 = arith.addf %70, %71 : vector<2x60xf32>
    %73 = math.tanh %72 : vector<2x60xf32>
    %cst_34 = arith.constant dense<0.000000e+00> : vector<2x60xf32>
    %74 = tpu.matmul %63, %10, %cst_34 {dimension_numbers = #tpu.dot_dimension_numbers<[1], [0], [0], [1], [0, 0, 1, 1], [], []>} : vector<2x60xf32>, vector<60x60xf32>, vector<2x60xf32> -> vector<2x60xf32>
    %75 = vector.broadcast %11 : vector<1x60xf32> to vector<2x60xf32>
    %76 = arith.addf %74, %75 : vector<2x60xf32>
    %cst_35 = arith.constant dense<0.000000e+00> : vector<2x60xf32>
    %77 = tpu.matmul %69, %9, %cst_35 {dimension_numbers = #tpu.dot_dimension_numbers<[1], [0], [0], [1], [0, 0, 1, 1], [], []>} : vector<2x60xf32>, vector<60x60xf32>, vector<2x60xf32> -> vector<2x60xf32>
    %78 = arith.addf %76, %77 : vector<2x60xf32>
    %79 = math.tanh %78 : vector<2x60xf32>
    %80 = vector.extract_strided_slice %7 {offsets = [14, 0], sizes = [2, 60], strides = [1, 1]} : vector<16x60xf32> to vector<2x60xf32>
    %cst_36 = arith.constant dense<0.000000e+00> : vector<2x60xf32>
    %81 = tpu.matmul %73, %8, %cst_36 {dimension_numbers = #tpu.dot_dimension_numbers<[1], [0], [0], [1], [0, 0, 1, 1], [], []>} : vector<2x60xf32>, vector<60x60xf32>, vector<2x60xf32> -> vector<2x60xf32>
    %82 = arith.addf %80, %81 : vector<2x60xf32>
    %83 = math.tanh %82 : vector<2x60xf32>
    %cst_37 = arith.constant dense<0.000000e+00> : vector<2x60xf32>
    %84 = tpu.matmul %73, %10, %cst_37 {dimension_numbers = #tpu.dot_dimension_numbers<[1], [0], [0], [1], [0, 0, 1, 1], [], []>} : vector<2x60xf32>, vector<60x60xf32>, vector<2x60xf32> -> vector<2x60xf32>
    %85 = vector.broadcast %11 : vector<1x60xf32> to vector<2x60xf32>
    %86 = arith.addf %84, %85 : vector<2x60xf32>
    %cst_38 = arith.constant dense<0.000000e+00> : vector<2x60xf32>
    %87 = tpu.matmul %79, %9, %cst_38 {dimension_numbers = #tpu.dot_dimension_numbers<[1], [0], [0], [1], [0, 0, 1, 1], [], []>} : vector<2x60xf32>, vector<60x60xf32>, vector<2x60xf32> -> vector<2x60xf32>
    %88 = arith.addf %86, %87 : vector<2x60xf32>
    %89 = math.tanh %88 : vector<2x60xf32>
    %cst_39 = arith.constant dense<0.000000e+00> : vector<2x60xf32>
    %90 = tpu.matmul %83, %10, %cst_39 {dimension_numbers = #tpu.dot_dimension_numbers<[1], [0], [0], [1], [0, 0, 1, 1], [], []>} : vector<2x60xf32>, vector<60x60xf32>, vector<2x60xf32> -> vector<2x60xf32>
    %91 = vector.broadcast %11 : vector<1x60xf32> to vector<2x60xf32>
    %92 = arith.addf %90, %91 : vector<2x60xf32>
    %cst_40 = arith.constant dense<0.000000e+00> : vector<2x60xf32>
    %93 = tpu.matmul %89, %9, %cst_40 {dimension_numbers = #tpu.dot_dimension_numbers<[1], [0], [0], [1], [0, 0, 1, 1], [], []>} : vector<2x60xf32>, vector<60x60xf32>, vector<2x60xf32> -> vector<2x60xf32>
    %94 = arith.addf %92, %93 : vector<2x60xf32>
    %95 = math.tanh %94 : vector<2x60xf32>
    %c0_41 = arith.constant 0 : index
    %c0_42 = arith.constant 0 : index
    %c0_43 = arith.constant 0 : index
    %96 = vector.load %arg11[%c0_41, %c0_42, %c0_43] : memref<2x2x60xf32, #tpu.memory_space<vmem>>, vector<1x2x60xf32>
    %97 = vector.shape_cast %96 : vector<1x2x60xf32> to vector<2x60xf32>
    %98 = vector.shape_cast %83 : vector<2x60xf32> to vector<1x2x60xf32>
    tpu.vector_store %arg11[%c0_41, %c0_42, %c0_43], %98 {strides = array<i32>} : memref<2x2x60xf32, #tpu.memory_space<vmem>>, vector<1x2x60xf32>,
    %c1_44 = arith.constant 1 : index
    %c0_45 = arith.constant 0 : index
    %c0_46 = arith.constant 0 : index
    %99 = vector.load %arg11[%c1_44, %c0_45, %c0_46] : memref<2x2x60xf32, #tpu.memory_space<vmem>>, vector<1x2x60xf32>
    %100 = vector.shape_cast %99 : vector<1x2x60xf32> to vector<2x60xf32>
    %101 = vector.shape_cast %95 : vector<2x60xf32> to vector<1x2x60xf32>
    tpu.vector_store %arg11[%c1_44, %c0_45, %c0_46], %101 {strides = array<i32>} : memref<2x2x60xf32, #tpu.memory_space<vmem>>, vector<1x2x60xf32>,
    %102 = tpu.concatenate %29, %39, %49, %59, %69, %79, %89, %95 in 0 : vector<2x60xf32>, vector<2x60xf32>, vector<2x60xf32>, vector<2x60xf32>, vector<2x60xf32>, vector<2x60xf32>, vector<2x60xf32>, vector<2x60xf32> -> vector<16x60xf32>
    %c0_47 = arith.constant 0 : index
    %c0_48 = arith.constant 0 : index
    %103 = vector.load %arg8[%c0_47, %c0_48] : memref<1x60xf32, #tpu.memory_space<vmem>>, vector<1x60xf32>
    %104 = vector.broadcast %103 : vector<1x60xf32> to vector<16x60xf32>
    %105 = arith.mulf %102, %104 : vector<16x60xf32>
    %cst_49 = arith.constant dense<0.000000e+00> : vector<16xf32>
    %106 = vector.multi_reduction <add>, %105, %cst_49 [1] : vector<16x60xf32> to vector<16xf32>
    %107 = vector.shape_cast %106 : vector<16xf32> to vector<16x1xf32>
    %c0_50 = arith.constant 0 : index
    %c0_51 = arith.constant 0 : index
    %108 = vector.load %arg9[%c0_50, %c0_51] : memref<1x1xf32, #tpu.memory_space<vmem>>, vector<1x1xf32>
    %109 = vector.broadcast %108 : vector<1x1xf32> to vector<16x1xf32>
    %110 = arith.addf %107, %109 : vector<16x1xf32>
    %c0_52 = arith.constant 0 : index
    %c0_53 = arith.constant 0 : index
    %111 = vector.load %arg10[%c0_52, %c0_53] : memref<16x1xf32, #tpu.memory_space<vmem>>, vector<16x1xf32>
    tpu.vector_store %arg10[%c0_52, %c0_53], %110 {strides = array<i32>} : memref<16x1xf32, #tpu.memory_space<vmem>>, vector<16x1xf32>,
    return
  }
}

</mosaic_0001>

<bundles_post_ra>
// kernel: rnnstep_pallas.1
= control target key start
LH: loop header
LB: loop body
LE: loop exit
PB: predicated region body
PF: predicated region fallthrough
CT: control target
= control target key end

     0   :  { %s1455_s0 = inlined_call_operand.vmem [shape: f32[16,1], index: 0, kind: input, shape index: {}]   ;;  %s1456_s1 = inlined_call_operand.vmem [shape: f32[2,2,60], index: 1, kind: input, shape index: {}]   ;;  %s1457_s2 = inlined_call_operand.vmem [shape: f32[1,60], index: 2, kind: input, shape index: {}]   ;;  %s1458_s3 = inlined_call_operand.hbm [shape: f32[60,60], index: 3, kind: input, shape index: {}]   ;;  %s1459_s4 = inlined_call_operand.hbm [shape: f32[60,60], index: 4, kind: input, shape index: {}]   ;;  %s1460_s5 = inlined_call_operand.vmem [shape: f32[1,60], index: 5, kind: input, shape index: {}]   ;;  %s1461_s6 = inlined_call_operand.hbm [shape: f32[60,60], index: 6, kind: input, shape index: {}]   ;;  %s1462_s7 = inlined_call_operand.vmem [shape: f32[1,60], index: 7, kind: input, shape index: {}]   ;;  %s1463_s8 = inlined_call_operand.vmem [shape: f32[1,60], index: 8, kind: input, shape index: {}]   ;;  %s1464_s9 = inlined_call_operand.<no memory space> [shape: f32[1,1], index: 9, kind: input, shape index: {}]   ;;  %s1465_s10 = inlined_call_operand.vmem [shape: f32[16,1], index: 10, kind: output, shape index: {0}]   ;;  %s1466_s11 = inlined_call_operand.hbm [shape: f32[2,2,60], index: 11, kind: output, shape index: {1}]  }
   0x1   :  { %v17_v0 = vstv %s1464_s9 }
   0x2   :  { %18 = vst [vmem:[#allocation2] sm:$0x1] %v17_v0 }
   0x3   :  { %19 = vsyncpa [#allocation4], 0 }
   0x4   :  { %20 = vsyncpa [#allocation7], 0 }
   0x5   :  { %21 = vsyncpa [#allocation5], 0  ;;  %s45_s21 = sshll.u32 %s1459_s4, 4  ;;  %s1009_s22 = smov [#allocation6]   ;;  %s46_s21 = int_to_ptr.hbm [resolvable:$true] %s45_s21 }
   0x6   :  { %s47_s23 = sshll.u32 %s1009_s22, 4  ;;  %s32_s26 = sshll.u32 %s1458_s3, 4  ;;  %s48_s23 = int_to_ptr.vmem [resolvable:$true] %s47_s23  ;;  %s33_s26 = int_to_ptr.hbm [resolvable:$true] %s32_s26 }
   0x7   :  { %s1010_s27 = smov 128   ;;  %s1011_s28 = smov 8  }
   0x8   :  { %53 = dma.hbm_to_vmem [thread:$0]  %s46_s21, 1024, %s48_s23, [#allocation7], %s1010_s27, %s1010_s27, %s1011_s28  }
   0x9   :  { %s1012_s9 = smov [#allocation3]   ;;  %s60_s13 = sshll.u32 %s1461_s6, 4  ;;  %s61_s13 = int_to_ptr.hbm [resolvable:$true] %s60_s13 }
   0xa   :  { %s34_s29 = sshll.u32 %s1012_s9, 4  ;;  %s1013_s4 = smov [#allocation8]   ;;  %s35_s29 = int_to_ptr.vmem [resolvable:$true] %s34_s29 }
   0xb   :  { %40 = dma.hbm_to_vmem [thread:$0]  %s33_s26, 1024, %s35_s29, [#allocation4], %s1010_s27, %s1010_s27, %s1011_s28  }
   0xc   :  { %s62_s14 = sshll.u32 %s1013_s4, 4  ;;  %s63_s14 = int_to_ptr.vmem [resolvable:$true] %s62_s14 }
   0xd   :  { %68 = dma.hbm_to_vmem [thread:$0]  %s61_s13, 1024, %s63_s14, [#allocation7], %s1010_s27, %s1010_s27, %s1011_s28  }
   0xe   :  { %1003 = dma.done.wait [#allocation4], 1024  }
   0xf   :  { %1004 = vsyncadd [#allocation4], 4294966272 }
  0x10   :  { %1005 = dma.done.wait [#allocation7], 2048  }
  0x11   :  { %1006 = vsyncadd [#allocation7], 4294965248  ;;  %v1014_v1 = vmov 0   ;;  %vm143_vm0 = vcmask 1043456   ;;  %v1090_v2 = vld [vmem:[#allocation3 + $0x38] sm:$0xf] }
  0x12   :  { %869 = vset.pattern.permute.xlu0 %v1014_v1  ;;  %v1092_v3 = vld [vmem:[#allocation3 + $0x30] sm:$0xff]  ;;  %812 = vmatpush.msk.msra.mxu0 %vm143_vm0, %v1090_v2  ;;  %v1098_v4 = vld [vmem:[#allocation3 + $0x28] sm:$0xff]  ;;  %v87_v5 = vld [vmem:[%s1455_s0] sm:$0xff]  ;;  %vm139_vm1 = vcmask 490496   ;;  %vm758_vm2 = vcmask 1041408   ;;  %vm761_vm3 = vcmask 1045504  }
  0x13   :  { %814 = vmatpush.msk.msra.mxu1 %vm143_vm0, %v1090_v2  ;;  %92 = vperm.xlu0 %869, %v87_v5   ;;  %v1104_v6 = vld [vmem:[#allocation3 + $0x20] sm:$0xff]  ;;  %v1108_v7 = vld [vmem:[#allocation3 + $0x18] sm:$0xff]  ;;  %v1112_v8 = vld [vmem:[#allocation3 + $0x10] sm:$0xff]  ;;  %vm784_vm4 = vcmask 7168   ;;  %vm740_vm5 = vcmask 490502   ;;  %s1015_s25 = smov [#allocation9]  }
  0x14   :  { %156 = vmatpush.msra.mxu0 %v1092_v3  ;;  %v88_v9 = vld [vmem:[%s1455_s0 + $0x8] sm:$0xff]  ;;  %v136_v12 = vld [vmem:[%s1456_s1] sm:$0x3]  ;;  %v1143_v13 = vld [vmem:[#allocation8 + $0x38] sm:$0xf]  ;;  %s793_s26 = sshll.u32 %s1015_s25, 4  ;;  %s794_s26 = int_to_ptr.vmem [resolvable:$true] %s793_s26 }
  0x15   :  { %181 = vmatpush.msra.mxu1 %v1092_v3  ;;  %v1119_v10 = vld [vmem:[#allocation3 + $0x8] sm:$0xff]  ;;  %v1123_v11 = vld [vmem:[#allocation3] sm:$0xff]  ;;  %816 = vmatpush.msk.msra.mxu2 %vm143_vm0, %v1143_v13  ;;  %v1151_v14 = vld [vmem:[#allocation8 + $0x30] sm:$0xff]  ;;  %s795_s9 = sshll.u32 %s1466_s11, 4  ;;  %vm743_vm6 = vcmask 484352   ;;  %s1016_s29 = smov 32   ;;  %s796_s9 = int_to_ptr.hbm [resolvable:$true] %s795_s9 }
  0x16   :  { %157 = vmatpush.msra.mxu0 %v1098_v4  ;;  %v1153_v15 = vld [vmem:[#allocation6 + $0x38] sm:$0xf]  ;;  %v1155_v16 = vld [vmem:[#allocation8 + $0x28] sm:$0xff]  ;;  %v1160_v17 = vld [vmem:[#allocation6 + $0x30] sm:$0xff]  ;;  %s1017_s30 = smov 2  }
  0x17   :  { %182 = vmatpush.msra.mxu1 %v1098_v4  ;;  %212 = vmatpush.msra.mxu2 %v1151_v14  ;;  %v1168_v18 = vld [vmem:[#allocation8 + $0x20] sm:$0xff]  ;;  %v1170_v19 = vld [vmem:[#allocation6 + $0x28] sm:$0xff]  ;;  %v1174_v20 = vld [vmem:[#allocation8 + $0x18] sm:$0xff] }
  0x18   :  { %158 = vmatpush.msra.mxu0 %v1104_v6  ;;  %818 = vmatpush.msk.msra.mxu3 %vm143_vm0, %v1153_v15  ;;  %v1176_v21 = vld [vmem:[#allocation6 + $0x20] sm:$0xff]  ;;  %v1182_v22 = vld [vmem:[#allocation8 + $0x10] sm:$0xff]  ;;  %v1184_v23 = vld [vmem:[#allocation6 + $0x18] sm:$0xff] }
  0x19   :  { %183 = vmatpush.msra.mxu1 %v1104_v6  ;;  %213 = vmatpush.msra.mxu2 %v1155_v16  ;;  %v1186_v24 = vld [vmem:[#allocation8 + $0x8] sm:$0xff]  ;;  %v1188_v25 = vld [vmem:[#allocation6 + $0x10] sm:$0xff]  ;;  %v1194_v26 = vld [vmem:[#allocation8] sm:$0xff] }
  0x1a   :  { %159 = vmatpush.msra.mxu0 %v1108_v7  ;;  %238 = vmatpush.msra.mxu3 %v1160_v17  ;;  %v1196_v27 = vld [vmem:[#allocation6 + $0x8] sm:$0xff]  ;;  %v1206_v29 = vld [vmem:[#allocation6] sm:$0xff]  ;;  %v870_v31 = vld [vmem:[%s1457_s2] ss:$0 sm:$0xff] }
  0x1b   :  { %184 = vmatpush.msra.mxu1 %v1108_v7  ;;  %97 = vperm.xlu0 %869, %v88_v9   ;;  %v811_v30 = vld [vmem:[%s1456_s1 + $0x2] sm:$0x3]  ;;  %v871_v32 = vld [vmem:[%s1460_s5] ss:$0 sm:$0xff] }
  0x1c   :  { %160 = vmatpush.msra.mxu0 %v1112_v8  ;;  %214 = vmatpush.msra.mxu2 %v1168_v18  ;;  %v1277_v44 = vld [vmem:[%s1462_s7] ss:$0 sm:$0xff] }
  0x1d   :  { %185 = vmatpush.msra.mxu1 %v1112_v8  ;;  %239 = vmatpush.msra.mxu3 %v1170_v19 }
  0x1e   :  { %161 = vmatpush.msra.mxu0 %v1119_v10  ;;  %215 = vmatpush.msra.mxu2 %v1174_v20 }
  0x1f   :  { %186 = vmatpush.msra.mxu1 %v1119_v10  ;;  %240 = vmatpush.msra.mxu3 %v1176_v21 }
  0x20   :  { %162 = vmatpush.msra.mxu0 %v1123_v11  ;;  %216 = vmatpush.msra.mxu2 %v1182_v22 }
  0x21   :  { %813 = vmatmul.msk.f32.vlgmr.msra.gmra.mxu0 %vm139_vm1, %v136_v12  ;;  %187 = vmatpush.msra.mxu1 %v1123_v11 }
  0x22   :  { %820 = vmatpush.msk.msrb.mxu0 %vm143_vm0, %v1090_v2  ;;  %241 = vmatpush.msra.mxu3 %v1184_v23 }
  0x23   :  { %822 = vmatpush.msk.msrb.mxu1 %vm143_vm0, %v1143_v13  ;;  %217 = vmatpush.msra.mxu2 %v1186_v24 }
  0x24   :  { %264 = vmatpush.msrb.mxu0 %v1092_v3  ;;  %242 = vmatpush.msra.mxu3 %v1188_v25 }
  0x25   :  { %289 = vmatpush.msrb.mxu1 %v1151_v14  ;;  %218 = vmatpush.msra.mxu2 %v1194_v26 }
  0x26   :  { %265 = vmatpush.msrb.mxu0 %v1098_v4  ;;  %243 = vmatpush.msra.mxu3 %v1196_v27 }
  0x27   :  { %290 = vmatpush.msrb.mxu1 %v1155_v16  ;;  %824 = vmatpush.msk.msrb.mxu2 %vm143_vm0, %v1153_v15 }
  0x28   :  { %266 = vmatpush.msrb.mxu0 %v1104_v6  ;;  %244 = vmatpush.msra.mxu3 %v1206_v29 }
  0x29   :  { %291 = vmatpush.msrb.mxu1 %v1168_v18  ;;  %819 = vmatmul.msk.f32.vlgmr.msra.gmra.mxu3 %vm139_vm1, %v811_v30 }
  0x2a   :  { %267 = vmatpush.msrb.mxu0 %v1108_v7  ;;  %312 = vmatpush.msrb.mxu2 %v1160_v17 }
  0x2b   :  { %292 = vmatpush.msrb.mxu1 %v1174_v20  ;;  %826 = vmatpush.msk.msrb.mxu3 %vm143_vm0, %v1090_v2 }
  0x2c   :  { %268 = vmatpush.msrb.mxu0 %v1112_v8  ;;  %313 = vmatpush.msrb.mxu2 %v1170_v19 }
  0x2d   :  { %293 = vmatpush.msrb.mxu1 %v1182_v22  ;;  %338 = vmatpush.msrb.mxu3 %v1092_v3 }
  0x2e   :  { %269 = vmatpush.msrb.mxu0 %v1119_v10  ;;  %314 = vmatpush.msrb.mxu2 %v1176_v21 }
  0x2f   :  { %294 = vmatpush.msrb.mxu1 %v1186_v24  ;;  %339 = vmatpush.msrb.mxu3 %v1098_v4 }
  0x30   :  { %270 = vmatpush.msrb.mxu0 %v1123_v11  ;;  %315 = vmatpush.msrb.mxu2 %v1184_v23 }
  0x31   :  { %295 = vmatpush.msrb.mxu1 %v1194_v26  ;;  %340 = vmatpush.msrb.mxu3 %v1104_v6 }
  0x32   :  { %828 = vmatpush.msk.msra.mxu0 %vm143_vm0, %v1143_v13  ;;  %316 = vmatpush.msrb.mxu2 %v1188_v25 }
  0x33   :  { %341 = vmatpush.msrb.mxu3 %v1108_v7 }
  0x34   :  { %363 = vmatpush.msra.mxu0 %v1151_v14  ;;  %317 = vmatpush.msrb.mxu2 %v1196_v27 }
  0x35   :  { %342 = vmatpush.msrb.mxu3 %v1112_v8 }
  0x36   :  { %364 = vmatpush.msra.mxu0 %v1155_v16  ;;  %318 = vmatpush.msrb.mxu2 %v1206_v29 }
  0x37   :  { %343 = vmatpush.msrb.mxu3 %v1119_v10 }
  0x38   :  { %365 = vmatpush.msra.mxu0 %v1168_v18 }
  0x39   :  { %344 = vmatpush.msrb.mxu3 %v1123_v11 }
  0x3a   :  { %366 = vmatpush.msra.mxu0 %v1174_v20 }
  0x3b   :  { %834 = vmatpush.msk.msra.mxu3 %vm143_vm0, %v1143_v13 }
  0x3c   :  { %367 = vmatpush.msra.mxu0 %v1182_v22 }
  0x3d   :  { %434 = vmatpush.msra.mxu3 %v1151_v14 }
  0x3e   :  { %368 = vmatpush.msra.mxu0 %v1186_v24 }
  0x3f   :  { %435 = vmatpush.msra.mxu3 %v1155_v16 }
  0x40   :  { %369 = vmatpush.msra.mxu0 %v1194_v26 }
  0x41   :  { %436 = vmatpush.msra.mxu3 %v1168_v18 }
  0x43   :  { %437 = vmatpush.msra.mxu3 %v1174_v20 }
  0x45   :  { %438 = vmatpush.msra.mxu3 %v1182_v22 }
  0x47   :  { %439 = vmatpush.msra.mxu3 %v1186_v24 }
  0x49   :  { %440 = vmatpush.msra.mxu3 %v1194_v26 }
  0x85   :  { %v93_v28 = vpop.permute.xlu0 %92 }
  0x86   :  { %v103_v36 = vmul.f32 %v870_v31, %v93_v28 }
  0x88   :  { %v1243_v37 = vadd.f32 %v871_v32, %v103_v36 }
  0x8d   :  { %v98_v33 = vpop.permute.xlu0 %97 }
  0x8e   :  { %v104_v34 = vmul.f32 %v870_v31, %v98_v33 }
  0x90   :  { %v1231_v35 = vadd.f32 %v871_v32, %v104_v34 }
  0x9e   :  { %v164_v38 = vpop.f32.mrf.mxu0 }
  0x9f   :  { %v167_v39 = vadd.f32 %v164_v38, %v1243_v37 }
  0xa1   :  { %875 = vtanh.f32 %v167_v39 }
  0xa7   :  { %v876_v40 = vpop.eup %875 }
  0xa8   :  { %815 = vmatmul.msk.f32.vlgmr.msra.gmra.mxu1 %vm139_vm1, %v876_v40  ;;  %817 = vmatmul.msk.f32.vlgmr.msra.gmra.mxu2 %vm139_vm1, %v876_v40 }
  0xa9   :  { %830 = vmatpush.msk.msra.mxu1 %vm143_vm0, %v1153_v15  ;;  %832 = vmatpush.msk.msra.mxu2 %vm143_vm0, %v1090_v2 }
  0xab   :  { %386 = vmatpush.msra.mxu1 %v1160_v17  ;;  %412 = vmatpush.msra.mxu2 %v1092_v3 }
  0xac   :  { %v246_v46 = vpop.f32.mrf.mxu3 }
  0xad   :  { %387 = vmatpush.msra.mxu1 %v1170_v19  ;;  %413 = vmatpush.msra.mxu2 %v1098_v4 }
  0xaf   :  { %388 = vmatpush.msra.mxu1 %v1176_v21  ;;  %414 = vmatpush.msra.mxu2 %v1104_v6 }
  0xb1   :  { %389 = vmatpush.msra.mxu1 %v1184_v23  ;;  %415 = vmatpush.msra.mxu2 %v1108_v7 }
  0xb3   :  { %390 = vmatpush.msra.mxu1 %v1188_v25  ;;  %416 = vmatpush.msra.mxu2 %v1112_v8 }
  0xb5   :  { %391 = vmatpush.msra.mxu1 %v1196_v27  ;;  %417 = vmatpush.msra.mxu2 %v1119_v10 }
  0xb7   :  { %392 = vmatpush.msra.mxu1 %v1206_v29  ;;  %418 = vmatpush.msra.mxu2 %v1123_v11 }
 0x125   :  { %v189_v41 = vpop.f32.mrf.mxu1 }
 0x126   :  { %v193_v42 = vrot.slane %v189_v41, 6 }
 0x128   :  { %v195_v43 = vadd.f32 %v193_v42, %v1243_v37 }
 0x12a   :  { %877 = vtanh.f32 %v195_v43 }
 0x12b   :  { %v220_v45 = vpop.f32.mrf.mxu2 }
 0x12c   :  { %v221_v47 = vadd.f32 %v1277_v44, %v220_v45 }
 0x12e   :  { %v249_v48 = vadd.f32 %v246_v46, %v221_v47 }
 0x130   :  { %v878_v49 = vpop.eup %877  ;;  %879 = vtanh.f32 %v249_v48 }
 0x131   :  { %v252_v50 = vrot.slane %v878_v49, 2 }
 0x133   :  { %821 = vmatmul.msk.f32.vlgmr.msrb.gmra.mxu0 %vm139_vm1, %v252_v50  ;;  %823 = vmatmul.msk.f32.vlgmr.msrb.gmra.mxu1 %vm139_vm1, %v252_v50 }
 0x134   :  { %836 = vmatpush.msk.msrb.mxu0 %vm143_vm0, %v1153_v15  ;;  %838 = vmatpush.msk.msrb.mxu1 %vm143_vm0, %v1090_v2 }
 0x136   :  { %v1286_v51 = vpop.eup %879  ;;  %457 = vmatpush.msrb.mxu0 %v1160_v17  ;;  %482 = vmatpush.msrb.mxu1 %v1092_v3 }
 0x137   :  { %825 = vmatmul.msk.f32.vlgmr.msrb.gmra.mxu2 %vm139_vm1, %v1286_v51 }
 0x138   :  { %458 = vmatpush.msrb.mxu0 %v1170_v19  ;;  %840 = vmatpush.msk.msrb.mxu2 %vm143_vm0, %v1143_v13 }
 0x139   :  { %483 = vmatpush.msrb.mxu1 %v1098_v4 }
 0x13a   :  { %459 = vmatpush.msrb.mxu0 %v1176_v21  ;;  %507 = vmatpush.msrb.mxu2 %v1151_v14 }
 0x13b   :  { %484 = vmatpush.msrb.mxu1 %v1104_v6 }
 0x13c   :  { %460 = vmatpush.msrb.mxu0 %v1184_v23  ;;  %508 = vmatpush.msrb.mxu2 %v1155_v16 }
 0x13d   :  { %485 = vmatpush.msrb.mxu1 %v1108_v7 }
 0x13e   :  { %461 = vmatpush.msrb.mxu0 %v1188_v25  ;;  %509 = vmatpush.msrb.mxu2 %v1168_v18 }
 0x13f   :  { %486 = vmatpush.msrb.mxu1 %v1112_v8 }
 0x140   :  { %462 = vmatpush.msrb.mxu0 %v1196_v27  ;;  %510 = vmatpush.msrb.mxu2 %v1174_v20 }
 0x141   :  { %487 = vmatpush.msrb.mxu1 %v1119_v10 }
 0x142   :  { %463 = vmatpush.msrb.mxu0 %v1206_v29  ;;  %511 = vmatpush.msrb.mxu2 %v1182_v22 }
 0x143   :  { %488 = vmatpush.msrb.mxu1 %v1123_v11 }
 0x144   :  { %512 = vmatpush.msrb.mxu2 %v1186_v24 }
 0x146   :  { %513 = vmatpush.msrb.mxu2 %v1194_v26 }
 0x1b0   :  { %v272_v52 = vpop.f32.mrf.mxu0  ;;  %v297_v55 = vpop.f32.mrf.mxu1 }
 0x1b1   :  { %v276_v53 = vrot.slane %v272_v52, 4  ;;  %v298_v56 = vadd.f32 %v1277_v44, %v297_v55 }
 0x1b3   :  { %v278_v54 = vadd.f32 %v276_v53, %v1243_v37 }
 0x1b5   :  { %881 = vtanh.f32 %v278_v54 }
 0x1ba   :  { %v320_v57 = vpop.f32.mrf.mxu2 }
 0x1bb   :  { %v882_v58 = vpop.eup %881  ;;  %v323_v59 = vadd.f32 %v320_v57, %v298_v56 }
 0x1bc   :  { %v326_v60 = vrot.slane %v882_v58, 4 }
 0x1bd   :  { %883 = vtanh.f32 %v323_v59 }
 0x1be   :  { %827 = vmatmul.msk.f32.vlgmr.msrb.gmra.mxu3 %vm139_vm1, %v326_v60  ;;  %829 = vmatmul.msk.f32.vlgmr.msra.gmra.mxu0 %vm139_vm1, %v326_v60 }
 0x1bf   :  { %842 = vmatpush.msk.msrb.mxu3 %vm143_vm0, %v1153_v15  ;;  %844 = vmatpush.msk.msra.mxu0 %vm143_vm0, %v1090_v2 }
 0x1c1   :  { %530 = vmatpush.msrb.mxu3 %v1160_v17  ;;  %556 = vmatpush.msra.mxu0 %v1092_v3 }
 0x1c3   :  { %v884_v61 = vpop.eup %883  ;;  %531 = vmatpush.msrb.mxu3 %v1170_v19  ;;  %557 = vmatpush.msra.mxu0 %v1098_v4 }
 0x1c4   :  { %831 = vmatmul.msk.f32.vlgmr.msra.gmra.mxu1 %vm139_vm1, %v884_v61  ;;  %v745_v28 = vrot.slane %v884_v61, 6 }
 0x1c5   :  { %532 = vmatpush.msrb.mxu3 %v1176_v21  ;;  %846 = vmatpush.msk.msra.mxu1 %vm143_vm0, %v1143_v13 }
 0x1c6   :  { %558 = vmatpush.msra.mxu0 %v1104_v6  ;;  %v759_v33 = vsel %vm758_vm2, %v1286_v51, %v745_v28 }
 0x1c7   :  { %533 = vmatpush.msrb.mxu3 %v1184_v23  ;;  %581 = vmatpush.msra.mxu1 %v1151_v14 }
 0x1c8   :  { %559 = vmatpush.msra.mxu0 %v1108_v7 }
 0x1c9   :  { %534 = vmatpush.msrb.mxu3 %v1188_v25  ;;  %582 = vmatpush.msra.mxu1 %v1155_v16 }
 0x1ca   :  { %560 = vmatpush.msra.mxu0 %v1112_v8 }
 0x1cb   :  { %535 = vmatpush.msrb.mxu3 %v1196_v27  ;;  %583 = vmatpush.msra.mxu1 %v1168_v18 }
 0x1cc   :  { %561 = vmatpush.msra.mxu0 %v1119_v10 }
 0x1cd   :  { %536 = vmatpush.msrb.mxu3 %v1206_v29  ;;  %584 = vmatpush.msra.mxu1 %v1174_v20 }
 0x1ce   :  { %562 = vmatpush.msra.mxu0 %v1123_v11 }
 0x1cf   :  { %585 = vmatpush.msra.mxu1 %v1182_v22 }
 0x1d1   :  { %586 = vmatpush.msra.mxu1 %v1186_v24 }
 0x1d3   :  { %587 = vmatpush.msra.mxu1 %v1194_v26 }
 0x23b   :  { %v371_v62 = vpop.f32.mrf.mxu0 }
 0x23c   :  { %v372_v63 = vadd.f32 %v1277_v44, %v371_v62 }
 0x241   :  { %v346_v0 = vpop.f32.mrf.mxu3  ;;  %v394_v1 = vpop.f32.mrf.mxu1 }
 0x242   :  { %v350_v5 = vrot.slane %v346_v0, 2  ;;  %v397_v9 = vadd.f32 %v394_v1, %v372_v63 }
 0x244   :  { %v352_v12 = vadd.f32 %v350_v5, %v1243_v37  ;;  %885 = vtanh.f32 %v397_v9 }
 0x246   :  { %887 = vtanh.f32 %v352_v12 }
 0x24a   :  { %v886_v30 = vpop.eup %885 }
 0x24b   :  { %v747_v31 = vrot.slane %v886_v30, 4  ;;  %837 = vmatmul.msk.f32.vlgmr.msrb.gmra.mxu0 %vm139_vm1, %v886_v30 }
 0x24c   :  { %v888_v32 = vpop.eup %887  ;;  %852 = vmatpush.msk.msrb.mxu0 %vm143_vm0, %v1143_v13 }
 0x24d   :  { %v400_v34 = vrot.slane %v888_v32, 6  ;;  %v760_v36 = vsel %vm143_vm0, %v759_v33, %v747_v31 }
 0x24e   :  { %655 = vmatpush.msrb.mxu0 %v1151_v14 }
 0x24f   :  { %833 = vmatmul.msk.f32.vlgmr.msra.gmra.mxu2 %vm139_vm1, %v400_v34  ;;  %835 = vmatmul.msk.f32.vlgmr.msra.gmra.mxu3 %vm139_vm1, %v400_v34 }
 0x250   :  { %848 = vmatpush.msk.msra.mxu2 %vm143_vm0, %v1153_v15  ;;  %850 = vmatpush.msk.msra.mxu3 %vm143_vm0, %v1090_v2 }
 0x251   :  { %656 = vmatpush.msrb.mxu0 %v1155_v16 }
 0x252   :  { %604 = vmatpush.msra.mxu2 %v1160_v17  ;;  %630 = vmatpush.msra.mxu3 %v1092_v3 }
 0x253   :  { %657 = vmatpush.msrb.mxu0 %v1168_v18 }
 0x254   :  { %605 = vmatpush.msra.mxu2 %v1170_v19  ;;  %631 = vmatpush.msra.mxu3 %v1098_v4 }
 0x255   :  { %658 = vmatpush.msrb.mxu0 %v1174_v20 }
 0x256   :  { %606 = vmatpush.msra.mxu2 %v1176_v21  ;;  %632 = vmatpush.msra.mxu3 %v1104_v6 }
 0x257   :  { %659 = vmatpush.msrb.mxu0 %v1182_v22 }
 0x258   :  { %607 = vmatpush.msra.mxu2 %v1184_v23  ;;  %633 = vmatpush.msra.mxu3 %v1108_v7 }
 0x259   :  { %660 = vmatpush.msrb.mxu0 %v1186_v24 }
 0x25a   :  { %608 = vmatpush.msra.mxu2 %v1188_v25  ;;  %634 = vmatpush.msra.mxu3 %v1112_v8 }
 0x25b   :  { %661 = vmatpush.msrb.mxu0 %v1194_v26 }
 0x25c   :  { %609 = vmatpush.msra.mxu2 %v1196_v27  ;;  %635 = vmatpush.msra.mxu3 %v1119_v10 }
 0x25e   :  { %610 = vmatpush.msra.mxu2 %v1206_v29  ;;  %636 = vmatpush.msra.mxu3 %v1123_v11  ;;  %v1387_v11 = vld [vmem:[%s1463_s8] ss:$0 sm:$0xff] }
 0x2c8   :  { %v465_v7 = vpop.f32.mrf.mxu0 }
 0x2d2   :  { %v420_v2 = vpop.f32.mrf.mxu2  ;;  %v442_v3 = vpop.f32.mrf.mxu3 }
 0x2d3   :  { %v423_v4 = vadd.f32 %v420_v2, %v1231_v35  ;;  %v443_v6 = vadd.f32 %v1277_v44, %v442_v3 }
 0x2d5   :  { %889 = vtanh.f32 %v423_v4  ;;  %v468_v37 = vadd.f32 %v465_v7, %v443_v6 }
 0x2d7   :  { %891 = vtanh.f32 %v468_v37 }
 0x2db   :  { %v890_v8 = vpop.eup %889 }
 0x2dc   :  { %839 = vmatmul.msk.f32.vlgmr.msrb.gmra.mxu1 %vm139_vm1, %v890_v8  ;;  %841 = vmatmul.msk.f32.vlgmr.msrb.gmra.mxu2 %vm139_vm1, %v890_v8 }
 0x2dd   :  { %v892_v10 = vpop.eup %891  ;;  %854 = vmatpush.msk.msrb.mxu1 %vm143_vm0, %v1153_v15  ;;  %856 = vmatpush.msk.msrb.mxu2 %vm143_vm0, %v1143_v13 }
 0x2de   :  { %843 = vmatmul.msk.f32.vlgmr.msrb.gmra.mxu3 %vm139_vm1, %v892_v10  ;;  %v749_v38 = vrot.slane %v892_v10, 2 }
 0x2df   :  { %678 = vmatpush.msrb.mxu1 %v1160_v17  ;;  %858 = vmatpush.msk.msrb.mxu3 %vm143_vm0, %v1153_v15 }
 0x2e0   :  { %v762_v39 = vsel %vm761_vm3, %v760_v36, %v749_v38  ;;  %704 = vmatpush.msrb.mxu2 %v1151_v14  ;;  %v1420_v14 = vld [vmem:[#allocation2] ss:$0 sm:$0xff] }
 0x2e1   :  { %v770_v40 = vmul.f32 %v1387_v11, %v762_v39  ;;  %679 = vmatpush.msrb.mxu1 %v1170_v19  ;;  %727 = vmatpush.msrb.mxu3 %v1160_v17 }
 0x2e2   :  { %705 = vmatpush.msrb.mxu2 %v1155_v16 }
 0x2e3   :  { %v772_v13 = vsel %vm139_vm1, %v770_v40, 0.0  ;;  %680 = vmatpush.msrb.mxu1 %v1176_v21  ;;  %728 = vmatpush.msrb.mxu3 %v1170_v19 }
 0x2e4   :  { %773 = vadd.xlane.f32.xlu1 %v772_v13  ;;  %706 = vmatpush.msrb.mxu2 %v1168_v18 }
 0x2e5   :  { %681 = vmatpush.msrb.mxu1 %v1184_v23  ;;  %729 = vmatpush.msrb.mxu3 %v1176_v21 }
 0x2e6   :  { %707 = vmatpush.msrb.mxu2 %v1174_v20 }
 0x2e7   :  { %682 = vmatpush.msrb.mxu1 %v1188_v25  ;;  %730 = vmatpush.msrb.mxu3 %v1184_v23 }
 0x2e8   :  { %708 = vmatpush.msrb.mxu2 %v1182_v22 }
 0x2e9   :  { %683 = vmatpush.msrb.mxu1 %v1196_v27  ;;  %731 = vmatpush.msrb.mxu3 %v1188_v25 }
 0x2ea   :  { %709 = vmatpush.msrb.mxu2 %v1186_v24 }
 0x2eb   :  { %684 = vmatpush.msrb.mxu1 %v1206_v29  ;;  %732 = vmatpush.msrb.mxu3 %v1196_v27 }
 0x2ec   :  { %710 = vmatpush.msrb.mxu2 %v1194_v26 }
 0x2ed   :  { %733 = vmatpush.msrb.mxu3 %v1206_v29 }
 0x357   :  { %v774_v15 = vpop.xlane.xlu1 %773 }
 0x358   :  { %v782_v16 = vadd.f32 %v1420_v14, %v774_v15 }
 0x359   :  { %v490_v17 = vpop.f32.mrf.mxu1 }
 0x35a   :  { %785 = vst.msk [vmem:[%s1465_s10] sm:$0xff] %vm784_vm4, %v782_v16  ;;  %v494_v18 = vrot.slane %v490_v17, 6 }
 0x35c   :  { %v496_v19 = vadd.f32 %v494_v18, %v1231_v35 }
 0x35e   :  { %893 = vtanh.f32 %v496_v19 }
 0x35f   :  { %v515_v20 = vpop.f32.mrf.mxu2 }
 0x360   :  { %v516_v21 = vadd.f32 %v1277_v44, %v515_v20 }
 0x361   :  { %v538_v22 = vpop.f32.mrf.mxu3 }
 0x362   :  { %v541_v23 = vadd.f32 %v538_v22, %v516_v21 }
 0x364   :  { %v894_v24 = vpop.eup %893  ;;  %895 = vtanh.f32 %v541_v23 }
 0x365   :  { %v544_v25 = vrot.slane %v894_v24, 2 }
 0x367   :  { %845 = vmatmul.msk.f32.vlgmr.msra.gmra.mxu0 %vm139_vm1, %v544_v25  ;;  %847 = vmatmul.msk.f32.vlgmr.msra.gmra.mxu1 %vm139_vm1, %v544_v25 }
 0x36a   :  { %v896_v26 = vpop.eup %895 }
 0x36b   :  { %849 = vmatmul.msk.f32.vlgmr.msra.gmra.mxu2 %vm139_vm1, %v896_v26 }
 0x3e4   :  { %v564_v27 = vpop.f32.mrf.mxu0  ;;  %v589_v42 = vpop.f32.mrf.mxu1 }
 0x3e5   :  { %v568_v29 = vrot.slane %v564_v27, 4  ;;  %v590_v43 = vadd.f32 %v1277_v44, %v589_v42 }
 0x3e7   :  { %v570_v41 = vadd.f32 %v568_v29, %v1231_v35 }
 0x3e9   :  { %897 = vtanh.f32 %v570_v41 }
 0x3ee   :  { %v612_v45 = vpop.f32.mrf.mxu2 }
 0x3ef   :  { %v898_v46 = vpop.eup %897  ;;  %v615_v47 = vadd.f32 %v612_v45, %v590_v43 }
 0x3f0   :  { %v618_v48 = vrot.slane %v898_v46, 4 }
 0x3f1   :  { %899 = vtanh.f32 %v615_v47 }
 0x3f2   :  { %851 = vmatmul.msk.f32.vlgmr.msra.gmra.mxu3 %vm139_vm1, %v618_v48  ;;  %853 = vmatmul.msk.f32.vlgmr.msrb.gmra.mxu0 %vm139_vm1, %v618_v48 }
 0x3f7   :  { %v900_v49 = vpop.eup %899 }
 0x3f8   :  { %855 = vmatmul.msk.f32.vlgmr.msrb.gmra.mxu1 %vm139_vm1, %v900_v49  ;;  %v751_v57 = vrot.slane %v900_v49, 6 }
 0x3fa   :  { %v763_v61 = vsel %vm758_vm2, %v896_v26, %v751_v57 }
 0x46f   :  { %v663_v50 = vpop.f32.mrf.mxu0 }
 0x470   :  { %v664_v51 = vadd.f32 %v1277_v44, %v663_v50 }
 0x475   :  { %v638_v52 = vpop.f32.mrf.mxu3  ;;  %v686_v53 = vpop.f32.mrf.mxu1 }
 0x476   :  { %v642_v54 = vrot.slane %v638_v52, 2  ;;  %v689_v55 = vadd.f32 %v686_v53, %v664_v51 }
 0x478   :  { %v644_v56 = vadd.f32 %v642_v54, %v1231_v35  ;;  %901 = vtanh.f32 %v689_v55 }
 0x47a   :  { %903 = vtanh.f32 %v644_v56 }
 0x47e   :  { %v902_v58 = vpop.eup %901 }
 0x47f   :  { %v753_v59 = vrot.slane %v902_v58, 4  ;;  %859 = vmatmul.msk.f32.vlgmr.msrb.gmra.mxu3 %vm139_vm1, %v902_v58 }
 0x480   :  { %v904_v60 = vpop.eup %903 }
 0x481   :  { %v692_v62 = vrot.slane %v904_v60, 6  ;;  %v764_v63 = vsel %vm143_vm0, %v763_v61, %v753_v59  ;;  %741 = vst.msk [vmem:[#allocation9 - $0x6] sm:$0xc0] %vm740_vm5, %v904_v60 }
 0x483   :  { %857 = vmatmul.msk.f32.vlgmr.msrb.gmra.mxu2 %vm139_vm1, %v692_v62 }
 0x502   :  { %v735_v1 = vpop.f32.mrf.mxu3 }
 0x506   :  { %v712_v0 = vpop.f32.mrf.mxu2 }
 0x507   :  { %v713_v35 = vadd.f32 %v1277_v44, %v712_v0 }
 0x509   :  { %v738_v5 = vadd.f32 %v735_v1, %v713_v35 }
 0x50b   :  { %905 = vtanh.f32 %v738_v5 }
 0x511   :  { %v906_v9 = vpop.eup %905 }
 0x512   :  { %v756_v12 = vrot.slane %v906_v9, 2  ;;  %744 = vst.msk [vmem:[#allocation9 + $0x2] sm:$0x3] %vm743_vm6, %v906_v9 }
 0x513   :  { %801 = dma.vmem_to_hbm [thread:$0]  %s794_s26, 64, %s796_s9, [#allocation5], %s1016_s29, %s1016_s29, %s1017_s30  }
 0x514   :  { %v765_v44 = vsel %vm761_vm3, %v764_v63, %v756_v12 }
 0x515   :  { %v771_v28 = vmul.f32 %v1387_v11, %v765_v44 }
 0x517   :  { %v775_v30 = vsel %vm139_vm1, %v771_v28, 0.0 }
 0x518   :  { %776 = vadd.xlane.f32.xlu1 %v775_v30 }
 0x58b   :  { %v777_v31 = vpop.xlane.xlu1 %776 }
 0x58c   :  { %v783_v32 = vadd.f32 %v1420_v14, %v777_v31 }
 0x58e   :  { %786 = vst.msk [vmem:[%s1465_s10 + $0x8] sm:$0xff] %vm784_vm4, %v783_v32 }
 0x58f   :  { %1007 = dma.done.wait [#allocation5], 64  }
 0x590   :  { %1008 = vsyncadd [#allocation5], 4294967232 }
 0x591   :  { %808 = vsyncpa [#allocation4], 1 }
 0x592   :  { %809 = vsyncpa [#allocation7], 1 }
 0x593   :  { %810 = vsyncpa [#allocation5], 1 }

</bundles_post_ra>
